<compile_context>
chip_gen: v7x
topology: tpu7x:2x2x1
jax: 0.10.0
libtpu: 0.0.40
codegen_flags: <defaults>
</compile_context>

<pallas_src>
import jax
import jax.numpy as jnp
from jax.experimental import pallas as pl
from jax.experimental.pallas import tpu as pltpu

INPUT_SIZE = 64


def _round_up(x, m):
    return ((x + m - 1) // m) * m


def _block_diag(w, p):
    """blockdiag(w, ..., w) with p copies; w is (fan_in, fan_out)."""
    fan_in, fan_out = w.shape
    out = jnp.zeros((p * fan_in, p * fan_out), w.dtype)
    for k in range(p):
        out = out.at[k * fan_in:(k + 1) * fan_in,
                     k * fan_out:(k + 1) * fan_out].set(w)
    return out


def _default_pack():
    """Rows packed per lane-row: 4 on 256-wide-MXU chips (v6e/v7x), else 2."""
    try:
        kind = jax.devices()[0].device_kind.lower()
    except Exception:
        return 2
    if ("v6" in kind) or ("v7" in kind) or ("tpu7" in kind):
        return 4
    return 2  # v5e (128x128 MXU) and unknown chips: p=2 is the safe baseline


def _choose_tile_b(batch, max_tile_b, min_tiles):
    """Tile size in original batch rows: multiple of 128, <= max_tile_b,
    >= min_tiles grid steps when the batch allows (v7x dual-TC occupancy),
    and padding waste capped at ~10% of the batch."""
    unit = 128
    b_unit = _round_up(batch, unit)
    waste_cap = max(unit, -(-batch // 10))           # ~10% of B, >= one unit
    want_tiles = min(min_tiles, b_unit // unit)
    t = max(unit, (min(int(max_tile_b), b_unit) // unit) * unit)
    while t >= unit:
        padded = _round_up(batch, t)
        if padded - batch <= waste_cap and padded // t >= want_tiles:
            return t
        t -= unit
    return unit


def value_net_kernel(x_ref, w1_ref, b1_ref, w2_ref, b2_ref,
                     w3_ref, b3_ref, w4_ref, b4_ref, o_ref):
    cdt = w1_ref.dtype                        # MXU compute dtype (bf16 or f32)
    x = x_ref[...].astype(cdt)                # (TM, 64p): f32 in HBM, cast here

    # Layer 1: packed Linear(64 -> 64) + ReLU.  MXU matmul, f32 accumulation;
    # bias add + ReLU on the VPU in f32.
    h = jnp.dot(x, w1_ref[...], preferred_element_type=jnp.float32)
    h = jnp.maximum(h + b1_ref[...], 0.0)

    # Layer 2: packed Linear(64 -> 32) + ReLU.
    h = jnp.dot(h.astype(cdt), w2_ref[...], preferred_element_type=jnp.float32)
    h = jnp.maximum(h + b2_ref[...], 0.0)

    # Layer 3: packed Linear(32 -> 16) + ReLU.
    h = jnp.dot(h.astype(cdt), w3_ref[...], preferred_element_type=jnp.float32)
    h = jnp.maximum(h + b3_ref[...], 0.0)

    # Layer 4: packed Linear(16 -> 1) + Tanh -> (TM, p) slab.
    z = jnp.dot(h.astype(cdt), w4_ref[...], preferred_element_type=jnp.float32)
    o_ref[...] = jnp.tanh(z + b4_ref[...]).astype(o_ref.dtype)


def value_net_forward(x, params, *, max_tile_b=8192, pack=None,
                      compute_dtype=jnp.bfloat16):
    """x: [B, INPUT_SIZE] float32 -> [B, 1] float32."""
    w1, b1, w2, b2, w3, b3, w4, b4 = params
    B, D = x.shape
    assert D == INPUT_SIZE, (B, D)

    p = int(pack) if pack is not None else _default_pack()
    assert p in (2, 4), p                      # 64*p must be a multiple of 128

    # Tile selection (in original batch rows).  min_tiles=2 keeps both v7x
    # TensorCores busy; the extra ~0.35us grid step is noise on 1-TC chips.
    tile_b = _choose_tile_b(B, max_tile_b, min_tiles=2)
    padded_b = _round_up(B, tile_b)
    num_tiles = padded_b // tile_b
    tm = tile_b // p                           # packed rows per grid step

    # Only materialize a pad when needed; the (B,64)->(B/p,64p) reshape is a
    # free row-major relabelling and x stays f32 (cast happens in-kernel), so
    # no extra wrapper-side HBM pass over the input.
    x_in = x if padded_b == B else jnp.pad(x, ((0, padded_b - B), (0, 0)))
    x_packed = x_in.reshape(padded_b // p, INPUT_SIZE * p)

    # Block-diagonal weights (off-diagonal zeros are exact in bf16) and
    # lane-tiled biases.  All tiny; DMA'd once and VMEM-resident.
    w1_c = _block_diag(w1, p).astype(compute_dtype)
    w2_c = _block_diag(w2, p).astype(compute_dtype)
    w3_c = _block_diag(w3, p).astype(compute_dtype)
    w4_c = _block_diag(w4, p).astype(compute_dtype)
    b1_c = jnp.tile(b1.astype(jnp.float32), (1, p))
    b2_c = jnp.tile(b2.astype(jnp.float32), (1, p))
    b3_c = jnp.tile(b3.astype(jnp.float32), (1, p))
    b4_c = jnp.tile(b4.astype(jnp.float32), (1, p))

    def _resident(arr):
        # Full-array block, constant index_map: DMA'd once, stays in VMEM.
        zeros = (0,) * arr.ndim
        return pl.BlockSpec(arr.shape, lambda i, _z=zeros: _z)

    # Per-tile VMEM (tile_b=8192, p=4): x f32 2 MiB x2 buffers, intermediates
    # ~3.5 MiB, weights <0.25 MiB -> well under the 16/32 MiB scoped defaults
    # on every generation, so no vmem_limit_bytes override is needed.
    out_packed = pl.pallas_call(
        value_net_kernel,
        out_shape=jax.ShapeDtypeStruct((padded_b // p, p), jnp.float32),
        grid=(num_tiles,),
        in_specs=[
            pl.BlockSpec((tm, INPUT_SIZE * p), lambda i: (i, 0)),   # x tile
            _resident(w1_c), _resident(b1_c),
            _resident(w2_c), _resident(b2_c),
            _resident(w3_c), _resident(b3_c),
            _resident(w4_c), _resident(b4_c),
        ],
        out_specs=pl.BlockSpec((tm, p), lambda i: (i, 0)),
        compiler_params=pltpu.CompilerParams(
            dimension_semantics=("parallel",)),    # v7x: shard tiles over 2 TCs
    )(x_packed, w1_c, b1_c, w2_c, b2_c, w3_c, b3_c, w4_c, b4_c)

    # Free row-major reshape back to one value per original batch row.
    return out_packed.reshape(padded_b, 1)[:B]


def init_params(key):
    """Deterministic init mimicking PyTorch Linear default
    (U[-1/sqrt(fan_in), 1/sqrt(fan_in)]). Weights stored [in, out]; biases [1, out]."""
    dims = [(INPUT_SIZE, 64), (64, 32), (32, 16), (16, 1)]
    params = []
    for fan_in, fan_out in dims:
        key, kw, kb = jax.random.split(key, 3)
        bound = 1.0 / jnp.sqrt(jnp.float32(fan_in))
        w = jax.random.uniform(kw, (fan_in, fan_out), jnp.float32, -bound, bound)
        b = jax.random.uniform(kb, (1, fan_out), jnp.float32, -bound, bound)
        params.extend([w, b])
    return tuple(params)


def value_net_ref(x, params):
    """Pure-JAX reference for correctness checking."""
    w1, b1, w2, b2, w3, b3, w4, b4 = params
    h = jnp.maximum(x @ w1 + b1, 0.0)
    h = jnp.maximum(h @ w2 + b2, 0.0)
    h = jnp.maximum(h @ w3 + b3, 0.0)
    return jnp.tanh(h @ w4 + b4)


if __name__ == "__main__":
    key = jax.random.PRNGKey(0)
    key, kx = jax.random.split(key)

    batch = 8
    x = jax.random.normal(kx, (batch, INPUT_SIZE), jnp.float32)
    params = init_params(key)
    ref = value_net_ref(x, params)

    # Full-precision path (f32 operands on the MXU), explicit p=2: tight check.
    out_f32 = jax.block_until_ready(
        value_net_forward(x, params, pack=2, compute_dtype=jnp.float32))
    assert out_f32.shape == (batch, 1), out_f32.shape
    assert jnp.allclose(out_f32, ref, atol=1e-4, rtol=1e-4), (out_f32, ref)

    # Default fast path (auto pack, bf16 operands, f32 accumulation): loose check.
    out_bf16 = jax.block_until_ready(value_net_forward(x, params))
    assert out_bf16.shape == (batch, 1), out_bf16.shape
    assert jnp.max(jnp.abs(out_bf16 - ref)) < 3e-2, (out_bf16, ref)

    # Explicit p=4 packing path (exercises 256-wide block-diagonal weights).
    out_p4 = jax.block_until_ready(value_net_forward(x, params, pack=4))
    assert out_p4.shape == (batch, 1), out_p4.shape
    assert jnp.max(jnp.abs(out_p4 - ref)) < 3e-2, (out_p4, ref)

    # Multi-tile grid + ragged-batch padding path (3 grid steps at tile 128).
    key, kx2 = jax.random.split(key)
    x2 = jax.random.normal(kx2, (300, INPUT_SIZE), jnp.float32)
    ref2 = value_net_ref(x2, params)
    out2 = jax.block_until_ready(value_net_forward(x2, params, max_tile_b=128))
    assert out2.shape == (300, 1), out2.shape
    assert jnp.max(jnp.abs(out2 - ref2)) < 3e-2, (out2, ref2)

    print("KERNEL_OK")
</pallas_src>

<mosaic_0001>
module attributes {stable_mosaic.version = 11 : i64} {
  func.func @value_net_kernel(%arg0: i32, %arg1: memref<64x128xf32, #tpu.memory_space<vmem>>, %arg2: memref<128x128xf32, #tpu.memory_space<vmem>>, %arg3: memref<1x128xf32, #tpu.memory_space<vmem>>, %arg4: memref<128x64xf32, #tpu.memory_space<vmem>>, %arg5: memref<1x64xf32, #tpu.memory_space<vmem>>, %arg6: memref<64x32xf32, #tpu.memory_space<vmem>>, %arg7: memref<1x32xf32, #tpu.memory_space<vmem>>, %arg8: memref<32x2xf32, #tpu.memory_space<vmem>>, %arg9: memref<1x2xf32, #tpu.memory_space<vmem>>, %arg10: memref<64x2xf32, #tpu.memory_space<vmem>>) attributes {dimension_semantics = [#tpu.dimension_semantics<parallel>], iteration_bounds = array<i64: 1>, scalar_prefetch = 0 : i64, scratch_operands = 0 : i64, tpu.core_type = #tpu.core_type<tc>, window_params = [{transform_indices = @transform_0, window_bounds = array<i64: 64, 128>}, {pipeline_mode = #tpu.pipeline_mode<synchronous>, transform_indices = @transform_1, window_bounds = array<i64: 128, 128>}, {pipeline_mode = #tpu.pipeline_mode<synchronous>, transform_indices = @transform_2, window_bounds = array<i64: 1, 128>}, {pipeline_mode = #tpu.pipeline_mode<synchronous>, transform_indices = @transform_3, window_bounds = array<i64: 128, 64>}, {pipeline_mode = #tpu.pipeline_mode<synchronous>, transform_indices = @transform_4, window_bounds = array<i64: 1, 64>}, {pipeline_mode = #tpu.pipeline_mode<synchronous>, transform_indices = @transform_5, window_bounds = array<i64: 64, 32>}, {pipeline_mode = #tpu.pipeline_mode<synchronous>, transform_indices = @transform_6, window_bounds = array<i64: 1, 32>}, {pipeline_mode = #tpu.pipeline_mode<synchronous>, transform_indices = @transform_7, window_bounds = array<i64: 32, 2>}, {pipeline_mode = #tpu.pipeline_mode<synchronous>, transform_indices = @transform_8, window_bounds = array<i64: 1, 2>}, {transform_indices = @transform_9, window_bounds = array<i64: 64, 2>}]} {
    %c0 = arith.constant 0 : index
    %c0_0 = arith.constant 0 : index
    %0 = vector.load %arg1[%c0, %c0_0] : memref<64x128xf32, #tpu.memory_space<vmem>>, vector<64x128xf32>
    %c0_1 = arith.constant 0 : index
    %c0_2 = arith.constant 0 : index
    %1 = vector.load %arg2[%c0_1, %c0_2] : memref<128x128xf32, #tpu.memory_space<vmem>>, vector<128x128xf32>
    %cst = arith.constant dense<0.000000e+00> : vector<64x128xf32>
    %2 = tpu.matmul %0, %1, %cst {dimension_numbers = #tpu.dot_dimension_numbers<[1], [0], [0], [1], [0, 0, 1, 1], [], []>} : vector<64x128xf32>, vector<128x128xf32>, vector<64x128xf32> -> vector<64x128xf32>
    %c0_3 = arith.constant 0 : index
    %c0_4 = arith.constant 0 : index
    %3 = vector.load %arg3[%c0_3, %c0_4] : memref<1x128xf32, #tpu.memory_space<vmem>>, vector<1x128xf32>
    %4 = vector.broadcast %3 : vector<1x128xf32> to vector<64x128xf32>
    %5 = arith.addf %2, %4 : vector<64x128xf32>
    %cst_5 = arith.constant 0.000000e+00 : f32
    %6 = vector.broadcast %cst_5 : f32 to vector<64x128xf32>
    %7 = arith.maximumf %5, %6 : vector<64x128xf32>
    %c0_6 = arith.constant 0 : index
    %c0_7 = arith.constant 0 : index
    %8 = vector.load %arg4[%c0_6, %c0_7] : memref<128x64xf32, #tpu.memory_space<vmem>>, vector<128x64xf32>
    %cst_8 = arith.constant dense<0.000000e+00> : vector<64x64xf32>
    %9 = tpu.matmul %7, %8, %cst_8 {dimension_numbers = #tpu.dot_dimension_numbers<[1], [0], [0], [1], [0, 0, 1, 1], [], []>} : vector<64x128xf32>, vector<128x64xf32>, vector<64x64xf32> -> vector<64x64xf32>
    %c0_9 = arith.constant 0 : index
    %c0_10 = arith.constant 0 : index
    %10 = vector.load %arg5[%c0_9, %c0_10] : memref<1x64xf32, #tpu.memory_space<vmem>>, vector<1x64xf32>
    %11 = vector.broadcast %10 : vector<1x64xf32> to vector<64x64xf32>
    %12 = arith.addf %9, %11 : vector<64x64xf32>
    %cst_11 = arith.constant 0.000000e+00 : f32
    %13 = vector.broadcast %cst_11 : f32 to vector<64x64xf32>
    %14 = arith.maximumf %12, %13 : vector<64x64xf32>
    %c0_12 = arith.constant 0 : index
    %c0_13 = arith.constant 0 : index
    %15 = vector.load %arg6[%c0_12, %c0_13] : memref<64x32xf32, #tpu.memory_space<vmem>>, vector<64x32xf32>
    %cst_14 = arith.constant dense<0.000000e+00> : vector<64x32xf32>
    %16 = tpu.matmul %14, %15, %cst_14 {dimension_numbers = #tpu.dot_dimension_numbers<[1], [0], [0], [1], [0, 0, 1, 1], [], []>} : vector<64x64xf32>, vector<64x32xf32>, vector<64x32xf32> -> vector<64x32xf32>
    %c0_15 = arith.constant 0 : index
    %c0_16 = arith.constant 0 : index
    %17 = vector.load %arg7[%c0_15, %c0_16] : memref<1x32xf32, #tpu.memory_space<vmem>>, vector<1x32xf32>
    %18 = vector.broadcast %17 : vector<1x32xf32> to vector<64x32xf32>
    %19 = arith.addf %16, %18 : vector<64x32xf32>
    %cst_17 = arith.constant 0.000000e+00 : f32
    %20 = vector.broadcast %cst_17 : f32 to vector<64x32xf32>
    %21 = arith.maximumf %19, %20 : vector<64x32xf32>
    %c0_18 = arith.constant 0 : index
    %c0_19 = arith.constant 0 : index
    %22 = vector.load %arg8[%c0_18, %c0_19] : memref<32x2xf32, #tpu.memory_space<vmem>>, vector<32x2xf32>
    %cst_20 = arith.constant dense<0.000000e+00> : vector<64x2xf32>
    %23 = tpu.matmul %21, %22, %cst_20 {dimension_numbers = #tpu.dot_dimension_numbers<[1], [0], [0], [1], [0, 0, 1, 1], [], []>} : vector<64x32xf32>, vector<32x2xf32>, vector<64x2xf32> -> vector<64x2xf32>
    %c0_21 = arith.constant 0 : index
    %c0_22 = arith.constant 0 : index
    %24 = vector.load %arg9[%c0_21, %c0_22] : memref<1x2xf32, #tpu.memory_space<vmem>>, vector<1x2xf32>
    %25 = vector.broadcast %24 : vector<1x2xf32> to vector<64x2xf32>
    %26 = arith.addf %23, %25 : vector<64x2xf32>
    %27 = math.tanh %26 : vector<64x2xf32>
    %c0_23 = arith.constant 0 : index
    %c0_24 = arith.constant 0 : index
    %28 = vector.load %arg10[%c0_23, %c0_24] : memref<64x2xf32, #tpu.memory_space<vmem>>, vector<64x2xf32>
    tpu.vector_store %arg10[%c0_23, %c0_24], %27 {strides = array<i32>} : memref<64x2xf32, #tpu.memory_space<vmem>>, vector<64x2xf32>,
    return
  }
  func.func @transform_0(%arg0: i32) -> (i32, i32) {
    %c0_i32 = arith.constant 0 : i32
    %c0_i32_0 = arith.constant 0 : i32
    return %arg0, %c0_i32 : i32, i32
  }
  func.func @transform_1(%arg0: i32) -> (i32, i32) {
    %c0_i32 = arith.constant 0 : i32
    %c0_i32_0 = arith.constant 0 : i32
    %c0_i32_1 = arith.constant 0 : i32
    return %c0_i32, %c0_i32_0 : i32, i32
  }
  func.func @transform_2(%arg0: i32) -> (i32, i32) {
    %c0_i32 = arith.constant 0 : i32
    %c0_i32_0 = arith.constant 0 : i32
    %c0_i32_1 = arith.constant 0 : i32
    return %c0_i32, %c0_i32_0 : i32, i32
  }
  func.func @transform_3(%arg0: i32) -> (i32, i32) {
    %c0_i32 = arith.constant 0 : i32
    %c0_i32_0 = arith.constant 0 : i32
    %c0_i32_1 = arith.constant 0 : i32
    return %c0_i32, %c0_i32_0 : i32, i32
  }
  func.func @transform_4(%arg0: i32) -> (i32, i32) {
    %c0_i32 = arith.constant 0 : i32
    %c0_i32_0 = arith.constant 0 : i32
    %c0_i32_1 = arith.constant 0 : i32
    return %c0_i32, %c0_i32_0 : i32, i32
  }
  func.func @transform_5(%arg0: i32) -> (i32, i32) {
    %c0_i32 = arith.constant 0 : i32
    %c0_i32_0 = arith.constant 0 : i32
    %c0_i32_1 = arith.constant 0 : i32
    return %c0_i32, %c0_i32_0 : i32, i32
  }
  func.func @transform_6(%arg0: i32) -> (i32, i32) {
    %c0_i32 = arith.constant 0 : i32
    %c0_i32_0 = arith.constant 0 : i32
    %c0_i32_1 = arith.constant 0 : i32
    return %c0_i32, %c0_i32_0 : i32, i32
  }
  func.func @transform_7(%arg0: i32) -> (i32, i32) {
    %c0_i32 = arith.constant 0 : i32
    %c0_i32_0 = arith.constant 0 : i32
    %c0_i32_1 = arith.constant 0 : i32
    return %c0_i32, %c0_i32_0 : i32, i32
  }
  func.func @transform_8(%arg0: i32) -> (i32, i32) {
    %c0_i32 = arith.constant 0 : i32
    %c0_i32_0 = arith.constant 0 : i32
    %c0_i32_1 = arith.constant 0 : i32
    return %c0_i32, %c0_i32_0 : i32, i32
  }
  func.func @transform_9(%arg0: i32) -> (i32, i32) {
    %c0_i32 = arith.constant 0 : i32
    %c0_i32_0 = arith.constant 0 : i32
    return %arg0, %c0_i32 : i32, i32
  }
}

</mosaic_0001>

<bundles_post_ra>
// kernel: tpu_custom_call.1
= control target key start
LH: loop header
LB: loop body
LE: loop exit
PB: predicated region body
PF: predicated region fallthrough
CT: control target
= control target key end

     0   :  { %vm327_vm0 = vcmask 523264   ;;  %vm476_vm1 = vcmask 261120   ;;  %vm614_vm2 = vcmask 15360   ;;  %s1229_s1 = inlined_call_operand.vmem [shape: f32[128,128], index: 1, kind: input, shape index: {}]   ;;  %s1230_s0 = inlined_call_operand.vmem [shape: f32[64,128], index: 0, kind: input, shape index: {}]   ;;  %s1231_s3 = inlined_call_operand.vmem [shape: f32[128,64], index: 3, kind: input, shape index: {}]   ;;  %s1232_s5 = inlined_call_operand.vmem [shape: f32[64,32], index: 5, kind: input, shape index: {}]   ;;  %s1233_s2 = inlined_call_operand.vmem [shape: f32[1,128], index: 2, kind: input, shape index: {}]   ;;  %s1234_s7 = inlined_call_operand.vmem [shape: f32[32,2], index: 7, kind: input, shape index: {}]   ;;  %s1235_s4 = inlined_call_operand.vmem [shape: f32[1,64], index: 4, kind: input, shape index: {}]   ;;  %s1236_s6 = inlined_call_operand.vmem [shape: f32[1,32], index: 6, kind: input, shape index: {}]   ;;  %s1237_s8 = inlined_call_operand.vmem [shape: f32[1,2], index: 8, kind: input, shape index: {}]   ;;  %s1238_s9 = inlined_call_operand.vmem [shape: f32[64,2], index: 9, kind: output, shape index: {}]  }
   0x1   :  { %v40_v0 = vld [vmem:[%s1229_s1] sm:$0xff]  ;;  %v41_v1 = vld [vmem:[%s1229_s1 + $0x8] sm:$0xff]  ;;  %v42_v2 = vld [vmem:[%s1229_s1 + $0x10] sm:$0xff] }
   0x2   :  { %v859_v3 = vpack.c.bf16 %v41_v1, %v40_v0  ;;  %v43_v4 = vld [vmem:[%s1229_s1 + $0x18] sm:$0xff]  ;;  %v44_v6 = vld [vmem:[%s1229_s1 + $0x20] sm:$0xff]  ;;  %v45_v7 = vld [vmem:[%s1229_s1 + $0x28] sm:$0xff] }
   0x3   :  { %v863_v5 = vpack.c.bf16 %v43_v4, %v42_v2  ;;  %v867_v8 = vpack.c.bf16 %v45_v7, %v44_v6  ;;  %v32_v9 = vld [vmem:[%s1230_s0] sm:$0xff]  ;;  %v46_v10 = vld [vmem:[%s1229_s1 + $0x30] sm:$0xff]  ;;  %v47_v11 = vld [vmem:[%s1229_s1 + $0x38] sm:$0xff] }
   0x4   :  { %860 = vmatprep.subr.bf16.mxu0 %v859_v3  ;;  %755 = vmatprep.mubr.f32.mxu0 %v32_v9  ;;  %v176_v12 = vld [vmem:[%s1231_s3] sm:$0xff]  ;;  %v177_v13 = vld [vmem:[%s1231_s3 + $0x8] sm:$0xff]  ;;  %v178_v14 = vld [vmem:[%s1231_s3 + $0x10] sm:$0xff]  ;;  %v871_v15 = vpack.c.bf16 %v47_v11, %v46_v10 }
   0x5   :  { %862 = vmatpush3.bf16.msra.mxu0 %v859_v3  ;;  %v48_v16 = vld [vmem:[%s1229_s1 + $0x40] sm:$0xff]  ;;  %v891_v17 = vpack.c.bf16 %v177_v13, %v176_v12  ;;  %v179_v18 = vld [vmem:[%s1231_s3 + $0x18] sm:$0xff]  ;;  %v49_v19 = vld [vmem:[%s1229_s1 + $0x48] sm:$0xff] }
   0x6   :  { %864 = vmatprep.subr.bf16.mxu0 %v863_v5  ;;  %v895_v20 = vpack.c.bf16 %v179_v18, %v178_v14  ;;  %v180_v21 = vld [vmem:[%s1231_s3 + $0x20] sm:$0xff]  ;;  %v181_v22 = vld [vmem:[%s1231_s3 + $0x28] sm:$0xff]  ;;  %v875_v23 = vpack.c.bf16 %v49_v19, %v48_v16  ;;  %v50_v24 = vld [vmem:[%s1229_s1 + $0x50] sm:$0xff] }
   0x7   :  { %892 = vmatprep.subr.bf16.mxu1 %v891_v17  ;;  %v899_v25 = vpack.c.bf16 %v181_v22, %v180_v21  ;;  %v51_v26 = vld [vmem:[%s1229_s1 + $0x58] sm:$0xff]  ;;  %v182_v27 = vld [vmem:[%s1231_s3 + $0x30] sm:$0xff]  ;;  %v52_v30 = vld [vmem:[%s1229_s1 + $0x60] sm:$0xff] }
   0x8   :  { %894 = vmatpush3.bf16.msra.mxu1 %v891_v17  ;;  %v183_v28 = vld [vmem:[%s1231_s3 + $0x38] sm:$0xff]  ;;  %v879_v29 = vpack.c.bf16 %v51_v26, %v50_v24  ;;  %v53_v32 = vld [vmem:[%s1229_s1 + $0x68] sm:$0xff]  ;;  %v184_v33 = vld [vmem:[%s1231_s3 + $0x40] sm:$0xff] }
   0x9   :  { %866 = vmatpush3.bf16.msra.mxu0 %v863_v5  ;;  %896 = vmatprep.subr.bf16.mxu1 %v895_v20  ;;  %v903_v31 = vpack.c.bf16 %v183_v28, %v182_v27  ;;  %v185_v34 = vld [vmem:[%s1231_s3 + $0x48] sm:$0xff]  ;;  %v883_v35 = vpack.c.bf16 %v53_v32, %v52_v30  ;;  %v54_v36 = vld [vmem:[%s1229_s1 + $0x70] sm:$0xff]  ;;  %v55_v38 = vld [vmem:[%s1229_s1 + $0x78] sm:$0xff] }
   0xa   :  { %868 = vmatprep.subr.bf16.mxu0 %v867_v8  ;;  %v907_v37 = vpack.c.bf16 %v185_v34, %v184_v33  ;;  %v186_v39 = vld [vmem:[%s1231_s3 + $0x50] sm:$0xff]  ;;  %v187_v40 = vld [vmem:[%s1231_s3 + $0x58] sm:$0xff]  ;;  %v887_v41 = vpack.c.bf16 %v55_v38, %v54_v36  ;;  %v188_v43 = vld [vmem:[%s1231_s3 + $0x60] sm:$0xff] }
   0xb   :  { %v911_v42 = vpack.c.bf16 %v187_v40, %v186_v39  ;;  %v189_v44 = vld [vmem:[%s1231_s3 + $0x68] sm:$0xff]  ;;  %v34_v47 = vld [vmem:[%s1230_s0 + $0x10] sm:$0xff]  ;;  %v35_v48 = vld [vmem:[%s1230_s0 + $0x18] sm:$0xff] }
   0xc   :  { %898 = vmatpush3.bf16.msra.mxu1 %v895_v20  ;;  %v915_v45 = vpack.c.bf16 %v189_v44, %v188_v43  ;;  %v33_v46 = vld [vmem:[%s1230_s0 + $0x8] sm:$0xff]  ;;  %v36_v49 = vld [vmem:[%s1230_s0 + $0x20] sm:$0xff]  ;;  %v38_v51 = vld [vmem:[%s1230_s0 + $0x30] sm:$0xff] }
   0xd   :  { %870 = vmatpush3.bf16.msra.mxu0 %v867_v8  ;;  %900 = vmatprep.subr.bf16.mxu1 %v899_v25  ;;  %v37_v50 = vld [vmem:[%s1230_s0 + $0x28] sm:$0xff]  ;;  %v39_v52 = vld [vmem:[%s1230_s0 + $0x38] sm:$0xff]  ;;  %v190_v53 = vld [vmem:[%s1231_s3 + $0x70] sm:$0xff] }
   0xe   :  { %872 = vmatprep.subr.bf16.mxu0 %v871_v15  ;;  %v191_v54 = vld [vmem:[%s1231_s3 + $0x78] sm:$0xff]  ;;  %v312_v56 = vld [vmem:[%s1232_s5] sm:$0xff]  ;;  %v313_v57 = vld [vmem:[%s1232_s5 + $0x8] sm:$0xff] }
   0xf   :  { %v919_v55 = vpack.c.bf16 %v191_v54, %v190_v53  ;;  %v314_v58 = vld [vmem:[%s1232_s5 + $0x10] sm:$0xff]  ;;  %v923_v59 = vpack.c.bf16 %v313_v57, %v312_v56  ;;  %v315_v60 = vld [vmem:[%s1232_s5 + $0x18] sm:$0xff]  ;;  %v316_v62 = vld [vmem:[%s1232_s5 + $0x20] sm:$0xff] }
  0x10   :  { %902 = vmatpush3.bf16.msra.mxu1 %v899_v25  ;;  %v927_v61 = vpack.c.bf16 %v315_v60, %v314_v58  ;;  %v317_v63 = vld [vmem:[%s1232_s5 + $0x28] sm:$0xff]  ;;  %v627_v1 = vld [vmem:[%s1233_s2] ss:$0 sm:$0xff]  ;;  %v318_v26 = vld [vmem:[%s1232_s5 + $0x30] sm:$0xff] }
  0x11   :  { %874 = vmatpush3.bf16.msra.mxu0 %v871_v15  ;;  %904 = vmatprep.subr.bf16.mxu1 %v903_v31  ;;  %v931_v0 = vpack.c.bf16 %v317_v63, %v316_v62  ;;  %v319_v27 = vld [vmem:[%s1232_s5 + $0x38] sm:$0xff]  ;;  %v466_v30 = vld [vmem:[%s1234_s7 + $0x8] sm:$0xff]  ;;  %v629_v60 = vld [vmem:[%s1236_s6] ss:$0 sm:$0xff] }
  0x12   :  { %876 = vmatprep.subr.bf16.mxu0 %v875_v23  ;;  %v935_v28 = vpack.c.bf16 %v319_v27, %v318_v26  ;;  %v468_v33 = vld [vmem:[%s1234_s7 + $0x18] sm:$0xff] }
  0x14   :  { %906 = vmatpush3.bf16.msra.mxu1 %v903_v31  ;;  %v467_v31 = vld [vmem:[%s1234_s7 + $0x10] sm:$0xff] }
  0x15   :  { %878 = vmatpush3.bf16.msra.mxu0 %v875_v23  ;;  %908 = vmatprep.subr.bf16.mxu1 %v907_v37  ;;  %v943_v34 = vpack.c.bf16 %v468_v33, %v467_v31 }
  0x16   :  { %880 = vmatprep.subr.bf16.mxu0 %v879_v29 }
  0x18   :  { %910 = vmatpush3.bf16.msra.mxu1 %v907_v37 }
  0x19   :  { %882 = vmatpush3.bf16.msra.mxu0 %v879_v29  ;;  %912 = vmatprep.subr.bf16.mxu1 %v911_v42  ;;  %v465_v29 = vld [vmem:[%s1234_s7] sm:$0xff] }
  0x1a   :  { %884 = vmatprep.subr.bf16.mxu0 %v883_v35  ;;  %v939_v32 = vpack.c.bf16 %v466_v30, %v465_v29 }
  0x1c   :  { %914 = vmatpush3.bf16.msra.mxu1 %v911_v42 }
  0x1d   :  { %886 = vmatpush3.bf16.msra.mxu0 %v883_v35  ;;  %916 = vmatprep.subr.bf16.mxu1 %v915_v45  ;;  %v628_v35 = vld [vmem:[%s1235_s4] ss:$0 sm:$0xff] }
  0x1e   :  { %888 = vmatprep.subr.bf16.mxu0 %v887_v41 }
  0x20   :  { %918 = vmatpush3.bf16.msra.mxu1 %v915_v45 }
  0x21   :  { %890 = vmatpush3.bf16.msra.mxu0 %v887_v41  ;;  %920 = vmatprep.subr.bf16.mxu1 %v919_v55 }
  0x22   :  { %924 = vmatprep.subr.bf16.mxu0 %v923_v59 }
  0x24   :  { %756 = vmatmul.mubr.f32.vlgmr.msra.gmra.mrb[0].mxu0 %v33_v46  ;;  %922 = vmatpush3.bf16.msra.mxu1 %v919_v55 }
  0x25   :  { %758 = vmatprep.mubr.f32.mxu0 %v34_v47  ;;  %926 = vmatpush3.bf16.msra.mxu0 %v923_v59 }
  0x26   :  { %928 = vmatprep.subr.bf16.mxu0 %v927_v61  ;;  %940 = vmatprep.subr.bf16.mxu1 %v939_v32 }
  0x28   :  { %759 = vmatmul.mubr.f32.gmra.mrb[2].mxu0 %v35_v48 }
  0x29   :  { %761 = vmatprep.mubr.f32.mxu0 %v36_v49  ;;  %930 = vmatpush3.bf16.msra.mxu0 %v927_v61 }
  0x2a   :  { %932 = vmatprep.subr.bf16.mxu0 %v931_v0 }
  0x2c   :  { %762 = vmatmul.mubr.f32.gmra.mrb[4].mxu0 %v37_v50 }
  0x2d   :  { %764 = vmatprep.mubr.f32.mxu0 %v38_v51  ;;  %934 = vmatpush3.bf16.msra.mxu0 %v931_v0 }
  0x2e   :  { %936 = vmatprep.subr.bf16.mxu0 %v935_v28 }
  0x30   :  { %765 = vmatmul.mubr.f32.gmra.mrb[6].mxu0 %v39_v52 }
  0x31   :  { %938 = vmatpush3.bf16.msra.mxu0 %v935_v28 }
  0xf7   :  { %v757_v2 = vpop.f32.mrb[0].mxu0 }
  0xf8   :  { %v135_v3 = vadd.f32 %v757_v2, %v627_v1  ;;  %v129_v4 = vpop.f32.mrb[1].mxu0 }
  0xf9   :  { %v130_v5 = vadd.f32 %v627_v1, %v129_v4 }
  0xfa   :  { %v169_v8 = vmax.f32 %v135_v3, 0.0 }
  0xfb   :  { %v760_v6 = vpop.f32.mrb[2].mxu0  ;;  %v168_v7 = vmax.f32 %v130_v5, 0.0 }
  0xfc   :  { %v145_v9 = vadd.f32 %v760_v6, %v627_v1  ;;  %v139_v10 = vpop.f32.mrb[3].mxu0 }
  0xfd   :  { %v140_v11 = vadd.f32 %v627_v1, %v139_v10  ;;  %799 = vmatprep.mubr.f32.mxu1 %v168_v7 }
  0xfe   :  { %800 = vmatmul.mubr.f32.vlgmr.msra.gmra.mrb[0].mxu1 %v169_v8  ;;  %v171_v14 = vmax.f32 %v145_v9, 0.0 }
  0xff   :  { %v170_v12 = vmax.f32 %v140_v11, 0.0  ;;  %v763_v13 = vpop.f32.mrb[4].mxu0  ;;  %942 = vmatpush3.bf16.msra.mxu1 %v939_v32 }
 0x100   :  { %v155_v15 = vadd.f32 %v763_v13, %v627_v1  ;;  %v149_v16 = vpop.f32.mrb[5].mxu0  ;;  %944 = vmatprep.subr.bf16.mxu1 %v943_v34 }
 0x101   :  { %v150_v17 = vadd.f32 %v627_v1, %v149_v16  ;;  %802 = vmatprep.mubr.f32.mxu1 %v170_v12 }
 0x102   :  { %803 = vmatmul.mubr.f32.gmra.mrb[2].mxu1 %v171_v14  ;;  %v173_v20 = vmax.f32 %v155_v15, 0.0 }
 0x103   :  { %v172_v18 = vmax.f32 %v150_v17, 0.0  ;;  %v766_v19 = vpop.f32.mrb[6].mxu0  ;;  %946 = vmatpush3.bf16.msra.mxu1 %v943_v34 }
 0x104   :  { %v165_v21 = vadd.f32 %v766_v19, %v627_v1  ;;  %v159_v22 = vpop.f32.mrb[7].mxu0 }
 0x105   :  { %v160_v23 = vadd.f32 %v627_v1, %v159_v22  ;;  %805 = vmatprep.mubr.f32.mxu1 %v172_v18 }
 0x106   :  { %806 = vmatmul.mubr.f32.gmra.mrb[4].mxu1 %v173_v20  ;;  %v175_v25 = vmax.f32 %v165_v21, 0.0  ;;  %v638_v21 = vld [vmem:[%s1237_s8] ss:$0 sm:$0xff] }
 0x107   :  { %v174_v24 = vmax.f32 %v160_v23, 0.0 }
 0x109   :  { %808 = vmatprep.mubr.f32.mxu1 %v174_v24 }
 0x10a   :  { %809 = vmatmul.mubr.f32.gmra.mrb[6].mxu1 %v175_v25 }
 0x1d1   :  { %v801_v36 = vpop.f32.mrb[0].mxu1 }
 0x1d2   :  { %v271_v37 = vadd.f32 %v801_v36, %v628_v35  ;;  %v265_v38 = vpop.f32.mrb[1].mxu1 }
 0x1d3   :  { %v266_v39 = vadd.f32 %v628_v35, %v265_v38 }
 0x1d4   :  { %v305_v42 = vmax.f32 %v271_v37, 0.0 }
 0x1d5   :  { %v304_v40 = vmax.f32 %v266_v39, 0.0  ;;  %v804_v41 = vpop.f32.mrb[2].mxu1 }
 0x1d6   :  { %v281_v43 = vadd.f32 %v804_v41, %v628_v35  ;;  %v275_v44 = vpop.f32.mrb[3].mxu1 }
 0x1d7   :  { %v276_v45 = vadd.f32 %v628_v35, %v275_v44  ;;  %827 = vmatprep.mubr.msk.f32.mxu0 %vm327_vm0, %v304_v40 }
 0x1d8   :  { %828 = vmatmul.mubr.msk.f32.vlgmr.msra.gmra.mrb[8].mxu0 %vm327_vm0, %v305_v42  ;;  %v307_v48 = vmax.f32 %v281_v43, 0.0 }
 0x1d9   :  { %v306_v46 = vmax.f32 %v276_v45, 0.0  ;;  %v807_v47 = vpop.f32.mrb[4].mxu1 }
 0x1da   :  { %v291_v49 = vadd.f32 %v807_v47, %v628_v35  ;;  %v285_v50 = vpop.f32.mrb[5].mxu1 }
 0x1db   :  { %v286_v51 = vadd.f32 %v628_v35, %v285_v50  ;;  %830 = vmatprep.mubr.msk.f32.mxu0 %vm327_vm0, %v306_v46 }
 0x1dc   :  { %831 = vmatmul.mubr.msk.f32.gmra.mrb[10].mxu0 %vm327_vm0, %v307_v48  ;;  %v309_v54 = vmax.f32 %v291_v49, 0.0 }
 0x1dd   :  { %v308_v52 = vmax.f32 %v286_v51, 0.0  ;;  %v810_v53 = vpop.f32.mrb[6].mxu1 }
 0x1de   :  { %v301_v55 = vadd.f32 %v810_v53, %v628_v35  ;;  %v295_v56 = vpop.f32.mrb[7].mxu1 }
 0x1df   :  { %v296_v57 = vadd.f32 %v628_v35, %v295_v56  ;;  %833 = vmatprep.mubr.msk.f32.mxu0 %vm327_vm0, %v308_v52 }
 0x1e0   :  { %834 = vmatmul.mubr.msk.f32.gmra.mrb[12].mxu0 %vm327_vm0, %v309_v54  ;;  %v311_v59 = vmax.f32 %v301_v55, 0.0 }
 0x1e1   :  { %v310_v58 = vmax.f32 %v296_v57, 0.0 }
 0x1e3   :  { %836 = vmatprep.mubr.msk.f32.mxu0 %vm327_vm0, %v310_v58 }
 0x1e4   :  { %837 = vmatmul.mubr.msk.f32.gmra.mrb[14].mxu0 %vm327_vm0, %v311_v59 }
 0x2ab   :  { %v829_v61 = vpop.f32.mrb[8].mxu0 }
 0x2ac   :  { %v424_v62 = vadd.f32 %v829_v61, %v629_v60  ;;  %v418_v63 = vpop.f32.mrb[9].mxu0 }
 0x2ad   :  { %v419_v0 = vadd.f32 %v629_v60, %v418_v63 }
 0x2ae   :  { %v458_v3 = vmax.f32 %v424_v62, 0.0 }
 0x2af   :  { %v457_v1 = vmax.f32 %v419_v0, 0.0  ;;  %v832_v2 = vpop.f32.mrb[10].mxu0 }
 0x2b0   :  { %v434_v4 = vadd.f32 %v832_v2, %v629_v60  ;;  %v428_v5 = vpop.f32.mrb[11].mxu0 }
 0x2b1   :  { %v429_v6 = vadd.f32 %v629_v60, %v428_v5  ;;  %847 = vmatprep.mubr.msk.f32.mxu1 %vm476_vm1, %v457_v1 }
 0x2b2   :  { %848 = vmatmul.mubr.msk.f32.vlgmr.msra.gmra.mrb[8].mxu1 %vm476_vm1, %v458_v3  ;;  %v460_v9 = vmax.f32 %v434_v4, 0.0 }
 0x2b3   :  { %v459_v7 = vmax.f32 %v429_v6, 0.0  ;;  %v835_v8 = vpop.f32.mrb[12].mxu0 }
 0x2b4   :  { %v444_v10 = vadd.f32 %v835_v8, %v629_v60  ;;  %v438_v11 = vpop.f32.mrb[13].mxu0 }
 0x2b5   :  { %v439_v12 = vadd.f32 %v629_v60, %v438_v11  ;;  %850 = vmatprep.mubr.msk.f32.mxu1 %vm476_vm1, %v459_v7 }
 0x2b6   :  { %851 = vmatmul.mubr.msk.f32.gmra.mrb[10].mxu1 %vm476_vm1, %v460_v9  ;;  %v462_v15 = vmax.f32 %v444_v10, 0.0 }
 0x2b7   :  { %v461_v13 = vmax.f32 %v439_v12, 0.0  ;;  %v838_v14 = vpop.f32.mrb[14].mxu0 }
 0x2b8   :  { %v454_v16 = vadd.f32 %v838_v14, %v629_v60  ;;  %v448_v17 = vpop.f32.mrb[15].mxu0 }
 0x2b9   :  { %v449_v18 = vadd.f32 %v629_v60, %v448_v17  ;;  %853 = vmatprep.mubr.msk.f32.mxu1 %vm476_vm1, %v461_v13 }
 0x2ba   :  { %854 = vmatmul.mubr.msk.f32.gmra.mrb[12].mxu1 %vm476_vm1, %v462_v15  ;;  %v464_v20 = vmax.f32 %v454_v16, 0.0 }
 0x2bb   :  { %v463_v19 = vmax.f32 %v449_v18, 0.0 }
 0x2bd   :  { %856 = vmatprep.mubr.msk.f32.mxu1 %vm476_vm1, %v463_v19 }
 0x2be   :  { %857 = vmatmul.mubr.msk.f32.gmra.mrb[14].mxu1 %vm476_vm1, %v464_v20 }
 0x385   :  { %v849_v22 = vpop.f32.mrb[8].mxu1 }
 0x386   :  { %v573_v23 = vadd.f32 %v849_v22, %v638_v21  ;;  %v567_v24 = vpop.f32.mrb[9].mxu1 }
 0x387   :  { %v568_v25 = vadd.f32 %v638_v21, %v567_v24 }
 0x388   :  { %947 = vtanh.f32 %v573_v23 }
 0x389   :  { %949 = vtanh.f32 %v568_v25  ;;  %v852_v26 = vpop.f32.mrb[10].mxu1 }
 0x38a   :  { %v583_v27 = vadd.f32 %v852_v26, %v638_v21  ;;  %v577_v28 = vpop.f32.mrb[11].mxu1 }
 0x38b   :  { %v578_v29 = vadd.f32 %v638_v21, %v577_v28 }
 0x38c   :  { %951 = vtanh.f32 %v583_v27 }
 0x38d   :  { %953 = vtanh.f32 %v578_v29  ;;  %v855_v30 = vpop.f32.mrb[12].mxu1 }
 0x38e   :  { %v593_v31 = vadd.f32 %v855_v30, %v638_v21  ;;  %v587_v32 = vpop.f32.mrb[13].mxu1 }
 0x38f   :  { %v588_v33 = vadd.f32 %v638_v21, %v587_v32 }
 0x390   :  { %955 = vtanh.f32 %v593_v31 }
 0x391   :  { %957 = vtanh.f32 %v588_v33  ;;  %v858_v34 = vpop.f32.mrb[14].mxu1 }
 0x392   :  { %v948_v35 = vpop.eup %947  ;;  %v603_v36 = vadd.f32 %v858_v34, %v638_v21  ;;  %v597_v37 = vpop.f32.mrb[15].mxu1 }
 0x393   :  { %v950_v38 = vpop.eup %949  ;;  %616 = vst.msk [vmem:[%s1238_s9 + $0x8] sm:$0xff] %vm614_vm2, %v948_v35  ;;  %v598_v39 = vadd.f32 %v638_v21, %v597_v37 }
 0x394   :  { %615 = vst.msk [vmem:[%s1238_s9] sm:$0xff] %vm614_vm2, %v950_v38  ;;  %959 = vtanh.f32 %v603_v36 }
 0x395   :  { %961 = vtanh.f32 %v598_v39 }
 0x396   :  { %v952_v40 = vpop.eup %951 }
 0x397   :  { %v954_v41 = vpop.eup %953  ;;  %618 = vst.msk [vmem:[%s1238_s9 + $0x18] sm:$0xff] %vm614_vm2, %v952_v40 }
 0x398   :  { %617 = vst.msk [vmem:[%s1238_s9 + $0x10] sm:$0xff] %vm614_vm2, %v954_v41 }
 0x39a   :  { %v956_v42 = vpop.eup %955 }
 0x39b   :  { %v958_v43 = vpop.eup %957  ;;  %620 = vst.msk [vmem:[%s1238_s9 + $0x28] sm:$0xff] %vm614_vm2, %v956_v42 }
 0x39c   :  { %619 = vst.msk [vmem:[%s1238_s9 + $0x20] sm:$0xff] %vm614_vm2, %v958_v43 }
 0x39e   :  { %v960_v44 = vpop.eup %959 }
 0x39f   :  { %v962_v45 = vpop.eup %961  ;;  %622 = vst.msk [vmem:[%s1238_s9 + $0x38] sm:$0xff] %vm614_vm2, %v960_v44 }
 0x3a0   :  { %621 = vst.msk [vmem:[%s1238_s9 + $0x30] sm:$0xff] %vm614_vm2, %v962_v45 }

</bundles_post_ra>
